<compile_context>
chip_gen: v5e
topology: v5e:2x2
jax: 0.10.0
libtpu: 0.0.40
codegen_flags: <defaults>
</compile_context>

<pallas_src>
import jax
import jax.numpy as jnp
from jax.experimental import pallas as pl
from jax.experimental.pallas import tpu as pltpu


_LANE = 128
_MAX_LANE_TILE = 16384                 # lanes per block cap
_VMEM_SOFT_CAP = 40 * 1024 * 1024      # double-buffered working-set cap (fits v7x 64 MiB)
_VMEM_LIMIT_MAX = 56 * 1024 * 1024     # never request more than this from the compiler


def _input_normalize_kernel(scale_ref, bias_ref, x_ref, o_ref):
    # x_ref / o_ref       : (row_blk, hw_tile) VMEM tiles
    # scale_ref / bias_ref: (row_blk, 1) VMEM tiles, broadcast across lanes
    x = jnp.clip(x_ref[...].astype(jnp.float32), 0.0, 1.0)   # torch.clamp(x, 0, 1)
    y = x * scale_ref[...] + bias_ref[...]                     # (x - mean) / std
    o_ref[...] = y.astype(o_ref.dtype)


def _sublane_align(*dtypes):
    """Sublane alignment: 8 for 32-bit, 16 for 16-bit, 32 for 8-bit dtypes."""
    a = 8
    for dt in dtypes:
        item = jnp.dtype(dt).itemsize
        a = max(a, 8 * max(1, 4 // max(1, item)))
    return a


def _aligned_tile(total, align, max_size):
    """Largest multiple of `align` <= min(total, max_size); prefers one that
    divides `total` (no masked edge block). Full extent if total <= align."""
    if total <= align:
        return total
    limit = min(total, max(align, max_size))
    top = (limit // align) * align
    t = top
    while t >= align:
        if total % t == 0:
            if t >= top // 2:
                return t          # a divisor that's still reasonably large
            break
        t -= align
    return top                    # aligned non-divisor; edge block is masked


def _shrink(tile, align):
    return max(align, ((tile // 2) // align) * align)


def input_normalize(x, mean, std, *, max_block_bytes=4 * 1024 * 1024):
    """(clamp(x, 0, 1) - mean[c]) / std[c] for NCHW input x."""
    N, C, H, W = x.shape
    assert mean.shape == (C,) and std.shape == (C,)

    rows, cols = N * C, H * W

    # Keep float outputs: integer inputs (e.g. uint8 images) must not be cast
    # back to int after normalization.
    out_dtype = x.dtype if jnp.issubdtype(x.dtype, jnp.floating) else jnp.float32
    x_item = jnp.dtype(x.dtype).itemsize
    out_item = jnp.dtype(out_dtype).itemsize
    align_rows = _sublane_align(x.dtype, out_dtype)

    # Per-channel scale = 1/std, bias = -mean/std (divide hoisted out of the
    # hot loop), replicated per (n, c) row of the flattened view.
    scale_c = (1.0 / std.astype(jnp.float32))
    bias_c = (-mean.astype(jnp.float32)) * scale_c
    scale = jnp.tile(scale_c, N).reshape(rows, 1)
    bias = jnp.tile(bias_c, N).reshape(rows, 1)

    x2 = x.reshape(rows, cols)

    # Lane tile: big 128-aligned chunk of H*W; row tile: dtype-aligned sublanes.
    hw_tile = _aligned_tile(cols, _LANE, _MAX_LANE_TILE)
    row_budget = max(align_rows, max_block_bytes // (hw_tile * max(x_item, out_item)))
    row_blk = _aligned_tile(rows, align_rows, row_budget)

    # Guard the double-buffered working set so it fits every generation's VMEM
    # (v7x has only 64 MiB physical per TC).
    def footprint(rb, ht):
        return 2 * rb * ht * (x_item + out_item) + 2 * 2 * rb * 4

    while footprint(row_blk, hw_tile) > _VMEM_SOFT_CAP and row_blk > align_rows:
        row_blk = _shrink(row_blk, align_rows)
    while footprint(row_blk, hw_tile) > _VMEM_SOFT_CAP and hw_tile > _LANE:
        hw_tile = _shrink(hw_tile, _LANE)

    n_row = -(-rows // row_blk)
    n_hw = -(-cols // hw_tile)

    # v7x has 2 TensorCores: make sure the parallel grid has >= 2 blocks.
    if n_row * n_hw < 2:
        if hw_tile > _LANE:
            hw_tile = _shrink(hw_tile, _LANE)
        elif row_blk > align_rows:
            row_blk = _shrink(row_blk, align_rows)
        n_row = -(-rows // row_blk)
        n_hw = -(-cols // hw_tile)

    vmem_limit = int(min(_VMEM_LIMIT_MAX,
                         max(32 * 1024 * 1024,
                             footprint(row_blk, hw_tile) + 4 * 1024 * 1024)))

    # Grid order: rows outer, hw inner — scale/bias block index (r, 0) is
    # constant across the inner loop, so they are DMA'd once per row block.
    out = pl.pallas_call(
        _input_normalize_kernel,
        out_shape=jax.ShapeDtypeStruct((rows, cols), out_dtype),
        grid_spec=pl.GridSpec(
            grid=(n_row, n_hw),
            in_specs=[
                pl.BlockSpec((row_blk, 1), lambda r, t: (r, 0)),
                pl.BlockSpec((row_blk, 1), lambda r, t: (r, 0)),
                pl.BlockSpec((row_blk, hw_tile), lambda r, t: (r, t)),
            ],
            out_specs=pl.BlockSpec((row_blk, hw_tile), lambda r, t: (r, t)),
        ),
        compiler_params=pltpu.CompilerParams(
            dimension_semantics=("parallel", "parallel"),
            vmem_limit_bytes=vmem_limit,
        ),
    )(scale, bias, x2)

    return out.reshape(N, C, H, W)


if __name__ == "__main__":
    key = jax.random.PRNGKey(0)
    N, C, H, W = 2, 4, 16, 16

    # Deterministic "buffer" initialization (matches the (C,) -> (C,1,1)
    # broadcast semantics of the PyTorch module).
    new_mean = jnp.array([0.485, 0.456, 0.406, 0.500], dtype=jnp.float32)
    new_std = jnp.array([0.229, 0.224, 0.225, 0.250], dtype=jnp.float32)

    # Inputs outside [0, 1] so the clamp is actually exercised.
    x = jax.random.uniform(key, (N, C, H, W), jnp.float32, minval=-0.5, maxval=1.5)

    out = input_normalize(x, new_mean, new_std)
    out = jax.block_until_ready(out)

    # Pure-JAX reference for correctness.
    ref = (jnp.clip(x, 0.0, 1.0) - new_mean[None, :, None, None]) / new_std[
        None, :, None, None
    ]
    assert out.shape == (N, C, H, W)
    assert out.dtype == x.dtype
    assert jnp.allclose(out, ref, atol=1e-5, rtol=1e-5)

    print("KERNEL_OK")
</pallas_src>

<mosaic_0001>
module attributes {stable_mosaic.version = 11 : i64} {
  func.func @_input_normalize_kernel(%arg0: i32, %arg1: i32, %arg2: memref<8x1xf32, #tpu.memory_space<vmem>>, %arg3: memref<8x1xf32, #tpu.memory_space<vmem>>, %arg4: memref<8x128xf32, #tpu.memory_space<vmem>>, %arg5: memref<8x128xf32, #tpu.memory_space<vmem>>) attributes {dimension_semantics = [#tpu.dimension_semantics<parallel>, #tpu.dimension_semantics<parallel>], iteration_bounds = array<i64: 1, 2>, scalar_prefetch = 0 : i64, scratch_operands = 0 : i64, tpu.core_type = #tpu.core_type<tc>, window_params = [{transform_indices = @transform_0, window_bounds = array<i64: 8, 1>}, {transform_indices = @transform_1, window_bounds = array<i64: 8, 1>}, {transform_indices = @transform_2, window_bounds = array<i64: 8, 128>}, {transform_indices = @transform_3, window_bounds = array<i64: 8, 128>}]} {
    %c0 = arith.constant 0 : index
    %c0_0 = arith.constant 0 : index
    %0 = vector.load %arg4[%c0, %c0_0] : memref<8x128xf32, #tpu.memory_space<vmem>>, vector<8x128xf32>
    %cst = arith.constant 0.000000e+00 : f32
    %cst_1 = arith.constant 1.000000e+00 : f32
    %1 = vector.broadcast %cst : f32 to vector<8x128xf32>
    %2 = arith.maximumf %1, %0 : vector<8x128xf32>
    %3 = vector.broadcast %cst_1 : f32 to vector<8x128xf32>
    %4 = arith.minimumf %3, %2 : vector<8x128xf32>
    %c0_2 = arith.constant 0 : index
    %c0_3 = arith.constant 0 : index
    %5 = vector.load %arg2[%c0_2, %c0_3] : memref<8x1xf32, #tpu.memory_space<vmem>>, vector<8x1xf32>
    %6 = vector.broadcast %5 : vector<8x1xf32> to vector<8x128xf32>
    %7 = arith.mulf %4, %6 : vector<8x128xf32>
    %c0_4 = arith.constant 0 : index
    %c0_5 = arith.constant 0 : index
    %8 = vector.load %arg3[%c0_4, %c0_5] : memref<8x1xf32, #tpu.memory_space<vmem>>, vector<8x1xf32>
    %9 = vector.broadcast %8 : vector<8x1xf32> to vector<8x128xf32>
    %10 = arith.addf %7, %9 : vector<8x128xf32>
    %c0_6 = arith.constant 0 : index
    %c0_7 = arith.constant 0 : index
    %11 = vector.load %arg5[%c0_6, %c0_7] : memref<8x128xf32, #tpu.memory_space<vmem>>, vector<8x128xf32>
    tpu.vector_store %arg5[%c0_6, %c0_7], %10 {strides = array<i32>} : memref<8x128xf32, #tpu.memory_space<vmem>>, vector<8x128xf32>,
    return
  }
  func.func @transform_0(%arg0: i32, %arg1: i32) -> (i32, i32) {
    %c0_i32 = arith.constant 0 : i32
    %c0_i32_0 = arith.constant 0 : i32
    return %arg0, %c0_i32 : i32, i32
  }
  func.func @transform_1(%arg0: i32, %arg1: i32) -> (i32, i32) {
    %c0_i32 = arith.constant 0 : i32
    %c0_i32_0 = arith.constant 0 : i32
    return %arg0, %c0_i32 : i32, i32
  }
  func.func @transform_2(%arg0: i32, %arg1: i32) -> (i32, i32) {
    %c0_i32 = arith.constant 0 : i32
    return %arg0, %arg1 : i32, i32
  }
  func.func @transform_3(%arg0: i32, %arg1: i32) -> (i32, i32) {
    %c0_i32 = arith.constant 0 : i32
    return %arg0, %arg1 : i32, i32
  }
}

</mosaic_0001>

<bundles_post_ra>
// kernel: tpu_custom_call.1
= control target key start
LH: loop header
LB: loop body
LE: loop exit
PB: predicated region body
PF: predicated region fallthrough
CT: control target
= control target key end

     0   :  { %8 = vsyncpa [#allocation3], 0  ;;  %s643_s0 = inlined_call_operand.vmem [shape: f32[8,1], index: 0, kind: input, shape index: {}]   ;;  %s644_s1 = inlined_call_operand.vmem [shape: f32[8,1], index: 1, kind: input, shape index: {}]   ;;  %s645_s2 = inlined_call_operand.vmem [shape: f32[8,256], index: 2, kind: input, shape index: {}]   ;;  %s646_s3 = inlined_call_operand.hbm [shape: f32[8,256], index: 3, kind: output, shape index: {}]  }
   0x1   :  { %10 = vsyncpa [#allocation3 + $0x1], 0  ;;  %s540_s12 = smov 0   ;;  %s542_s13 = smov 0  }
   0x2   :  { %s544_s14 = smov 0   ;;  %s546_s15 = smov 0  }
   0x3   :  { %s548_s16 = smov 0   ;;  %s550_s17 = smov 0  }
   0x4 LB: > { %s369_s18 = sadd.s32 4294967295, %s517_s17   ;;  %s370_s19 = sadd.s32 4294967294, %s517_s17   ;;  %s517_s17 = sphi %s550_s17, %s16_s17   ;;  %s513_s16 = sphi %s548_s16, %s653_s16   ;;  %s509_s15 = sphi %s546_s15, %s652_s15   ;;  %s505_s14 = sphi %s544_s14, %s651_s14   ;;  %s501_s13 = sphi %s542_s13, %s650_s13   ;;  %s497_s12 = sphi %s540_s12, %s649_s12  }
   0x5   : > { %s25_s20 = sadd.s32 1, %s513_s16  ;;  %s117_s21 = sadd.s32 1, %s505_s14 }
   0x6   : > { %p26_p0 = scmp.ge.s32.totalorder %s25_s20, 2  ;;  %p127_p1 = scmp.ne.s32.totalorder %s505_s14, %s501_s13 }
   0x7   : > { %p128_p2 = scmp.eq.s32.totalorder %s369_s18, 1  ;;  %p133_p3 = scmp.ne.s32.totalorder %s501_s13, %s497_s12 }
   0x8   : > { %s655_s20 = smov (%p26_p0, %s25_s20), 0  ;;  %p134_p5 = scmp.eq.s32.totalorder %s370_s19, 1 }
   0x9   : > { %p580_p4 = por %p128_p2, %p127_p1  ;;  %s113_s23 = ssub.s32 %s513_s16, %s655_s20 }
   0xa   : > { %p375_p6 = scmp.ge.s32.totalorder %s517_s17, 1  ;;  %p115_p7 = scmp.eq.s32.totalorder %s113_s23, 0 }
   0xb   : > { %p587_p8 = por %p134_p5, %p133_p3  ;;  %p177_p9 = scmp.lt.s32.totalorder %s517_s17, 3 }
   0xc   : > { %s593_s25 = scalar_select %p115_p7, %s505_s14, %s117_s21  }
   0xd   : > { %p178_p10 = pnand %p375_p6, %p177_p9 }
   0xe   : > { %p222_p11 = scmp.lt.s32.totalorder (!%p178_p10), %s509_s15, 1  ;;  %s209_s8 = sand.u32 (!%p178_p10), 1, %s501_s13  }
   0xf   : > { %181 = sbr.rel (%p178_p10) target bundleno = 150 (0x96), region = 32  ;;  %s376_s9 = sshll.u32 (!%p178_p10), %s209_s8, 3 }
  0x10   : > { %s379_s10 = sshll.u32 (!%p178_p10), %s509_s15, 3  ;;  %s211_s21 = scalar_lea.vmem (!%p178_p10), [#allocation2], %s376_s9 }
  0x11   : > { %s259_s19 = scalar_lea.hbm (!%p178_p10), %s646_s3, %s379_s10  ;;  %s261_s23 = sshll.u32 (!%p178_p10), %s211_s21, 4  ;;  %s262_s23 = int_to_ptr.vmem [resolvable:$true] %s261_s23 }
  0x12   : > { %s263_s26 = sshll.u32 (!%p178_p10), %s259_s19, 4  ;;  %s247_s27 = scalar_lea.sflag (!%p178_p10), [#allocation3], %s209_s8  ;;  %s264_s26 = int_to_ptr.hbm [resolvable:$true] %s263_s26 }
  0x13   : > { %s453_s28 = sshra.s32 (!%p178_p10), %s264_s26, 4  ;;  %s454_s28 = int_to_ptr.hbm [resolvable:$true] %s453_s28 }
  0x14   : > { %v231_v0 = vld [vmem:[%s643_s0] sm:$0xff]  ;;  %v519_v1 = vmov 0   ;;  %s223_s30 = scalar_select %p222_p11, %s509_s15, 1 }
  0x15   : > { %438 = vset.pattern.permute.xlu0 %v519_v1  ;;  %v238_v2 = vld [vmem:[%s644_s1] sm:$0xff]  ;;  %s455_s29 = scalar_lea.hbm %s454_s28, 8  ;;  %p460_p1 = scmp.lt.s32.totalorder %s454_s28, %s646_s3 }
  0x16   : > { %234 = vperm.xlu0 %438, %v231_v0   ;;  %s377_s4 = sshll.u32 %s223_s30, 3  ;;  %p456_p12 = scmp.ne.s32.totalorder %s454_s28, %s455_s29 }
  0x17   : > { %s227_s7 = scalar_lea.vmem %s645_s2, %s377_s4  ;;  %s459_s4 = scalar_lea.hbm %s646_s3, 16 }
  0x18   : > { %v228_v3 = vld [vmem:[%s227_s7] sm:$0xff]  ;;  %p457_p13 = pnand %p456_p12, %p580_p4  ;;  %p461_p2 = scmp.lt.s32.totalorder %s459_s4, %s455_s29 }
  0x19   : > { %v229_v4 = vmax.f32 %v228_v3, 0.0 }
  0x1a   : > { %p458_p0 = pneg %p457_p13  ;;  %p462_p3 = por %p461_p2, %p460_p1 }
  0x1b   : > { %v230_v6 = vmin.f32 %v229_v4, 1.0 }
  0x1c   : > { %p463_p5 = pnand %p462_p3, %p458_p0 }
  0x1e   : > { %241 = vperm.xlu0 %438, %v238_v2  }
  0x88   : > { %v235_v5 = vpop.permute.xlu0 %234 }
  0x89   : > { %v237_v7 = vmul.f32 %v235_v5, %v230_v6 }
  0x90   : > { %v242_v8 = vpop.permute.xlu0 %241 }
  0x91   : > { %v244_v9 = vadd.f32 %v242_v8, %v237_v7 }
  0x93   : > { %245 = vst [vmem:[%s211_s21] sm:$0xff] %v244_v9 }
  0x94   : > { %466 = shalt.err (!%p463_p5)
}
  0x95   : > { %382 = dma.vmem_to_hbm [thread:$0]  (%p580_p4), %s262_s23, 128, %s264_s26, %s247_s27  }
  0x96 PF: > { %p388_p6 = scmp.ge.s32.totalorder %s517_s17, 2  ;;  %s275_s7 = sand.u32 1, %s497_s12  }
  0x97   : > { %s276_s8 = scalar_lea.sflag [#allocation3], %s275_s7 }
  0x98   : > { %p385_p7 = pnand %p388_p6, %p587_p8 }
  0x9a   : > { %p386_p9 = pneg %p385_p7 }
  0x9c   : > { %492 = dma.done.wait (%p386_p9), %s276_s8, 128  }
  0x9d   : > { %494 = vsyncadd (%p386_p9), %s276_s8, 4294967168  ;;  %s16_s17 = sadd.s32 1, %s517_s17   ;;  %s649_s12 = smov %s501_s13 }
  0x9e   : > { %p13_p10 = scmp.ge.s32.totalorder %s16_s17, 4   ;;  %s650_s13 = smov %s505_s14 }
  0x9f   : > { %s651_s14 = smov %s593_s25  ;;  %s652_s15 = smov %s513_s16 }
  0xa0   : > { %s653_s16 = smov %s655_s20  ;;  %15 = sbr.rel (!%p13_p10) target bundleno = 4 (0x4), region = 73 }
  0xa5   :  { %282 = vsyncpa [#allocation3], 1 }
  0xa6   :  { %284 = vsyncpa [#allocation3 + $0x1], 1 }

</bundles_post_ra>
